<compile_context>
chip_gen: v7x
topology: tpu7x:2x2x1
jax: 0.10.0
libtpu: 0.0.40
codegen_flags: <defaults>
</compile_context>

<pallas_src>
import functools

import jax
import jax.numpy as jnp
from jax import lax
from jax.experimental import pallas as pl
from jax.experimental.pallas import tpu as pltpu


def _imput_loss_kernel(x_ref, y_ref, r_ref, sx, sy, sxy, sxx, syy, *,
                       n_true, mask_rows, use_mxu):
    """Grid = (D tiles [parallel], N tiles [arbitrary reduction])."""
    n_step = pl.program_id(1)
    tile_n = x_ref.shape[0]

    @pl.when(n_step == 0)
    def _init():
        for s in (sx, sy, sxy, sxx, syy):
            s[...] = jnp.zeros_like(s)

    x = x_ref[...].astype(jnp.float32)        # (tile_n, tile_d)
    y = y_ref[...].astype(jnp.float32)

    if mask_rows:
        # Edge N-block: rows past n_true hold undefined data -> zero them so
        # they contribute nothing to any moment sum.
        limit = n_true - n_step * tile_n
        row = lax.broadcasted_iota(jnp.int32, (tile_n, 1), 0)
        valid = row < limit
        x = jnp.where(valid, x, 0.0)
        y = jnp.where(valid, y, 0.0)

    if use_mxu:
        # Offload the five column sums to the (otherwise idle) MXU.  The
        # constant LHS is 1/8 so the eight identical result rows sum exactly
        # to the column total in _finalize (same finalize path as VPU mode).
        lhs = jnp.full((8, tile_n), 0.125, dtype=jnp.float32)

        def colsum(v):
            return lax.dot_general(
                lhs, v, (((1,), (0,)), ((), ())),
                preferred_element_type=jnp.float32,
                precision=lax.Precision.HIGHEST)
    else:
        # Per-sublane partial sums: vreg-wise VPU adds only; the 8 -> 1
        # cross-sublane (XLU) reduce is deferred to _finalize.
        def colsum(v):
            return jnp.sum(v.reshape(tile_n // 8, 8, v.shape[-1]), axis=0)

    sx[...] += colsum(x)
    sy[...] += colsum(y)
    sxy[...] += colsum(x * y)
    sxx[...] += colsum(x * x)
    syy[...] += colsum(y * y)

    @pl.when(n_step == pl.num_programs(1) - 1)
    def _finalize():
        n = jnp.float32(n_true)
        s_x = jnp.sum(sx[...], axis=0, keepdims=True)
        s_y = jnp.sum(sy[...], axis=0, keepdims=True)
        s_xy = jnp.sum(sxy[...], axis=0, keepdims=True)
        s_xx = jnp.sum(sxx[...], axis=0, keepdims=True)
        s_yy = jnp.sum(syy[...], axis=0, keepdims=True)
        mx = s_x / n
        my = s_y / n
        cov = s_xy / n - mx * my                      # denominator N (torch.mean)
        x_var = (s_xx - n * mx * mx) / (n - 1.0)      # unbiased (torch.std)
        y_var = (s_yy - n * my * my) / (n - 1.0)
        x_std = jnp.sqrt(jnp.maximum(x_var, 0.0))     # clamp cancellation noise
        y_std = jnp.sqrt(jnp.maximum(y_var, 0.0))
        r_ref[...] = cov / (x_std * y_std + jnp.float32(1e-6))


def _round_up(a, b):
    return ((a + b - 1) // b) * b


def imput_loss(x, y, *, tile_n_max=512, tile_d_max=1024, use_mxu_sums=False):
    """x, y: identically shaped arrays [N, ...]. Returns scalar f32 loss.

    Inputs may be f32 or bf16 (bf16 halves HBM traffic; accumulation is f32).
    N == 1 yields NaN (division by N-1 == 0), mirroring torch.std.
    Set use_mxu_sums=True in VALU-bound regimes (v7x, or bf16 inputs on v6e)
    to move the five column sums onto the otherwise-idle MXU.
    """
    assert x.shape == y.shape
    n = x.shape[0]
    d = 1
    for s in x.shape[1:]:
        d *= s
    # Mean over trailing dims == mean over flattened trailing dims.
    x2 = jnp.reshape(x, (n, d))
    y2 = jnp.reshape(y, (n, d))

    itemsize = jnp.dtype(x2.dtype).itemsize
    row_align = max(8, 8 * (4 // itemsize))   # 8 (f32) / 16 (bf16) / 32 (int8)

    # Balanced tiles: slack in the single edge block never exceeds
    # (row_align - 1) rows / 127 lanes, and there is no wrapper-side jnp.pad.
    num_n = pl.cdiv(n, tile_n_max)
    tile_n = _round_up(pl.cdiv(n, num_n), row_align)
    num_n = pl.cdiv(n, tile_n)

    num_d = pl.cdiv(d, tile_d_max)
    if num_d < 2 and d > 128:
        num_d = 2                  # >=2 parallel D tiles so both v7x TCs work
    tile_d = _round_up(pl.cdiv(d, num_d), 128)
    num_d = pl.cdiv(d, tile_d)
    d_cols = num_d * tile_d        # tiny, output-only padding (sliced below)

    mask_rows = (n % tile_n) != 0
    kernel = functools.partial(_imput_loss_kernel, n_true=n,
                               mask_rows=mask_rows, use_mxu=use_mxu_sums)

    r_row = pl.pallas_call(
        kernel,
        out_shape=jax.ShapeDtypeStruct((1, d_cols), jnp.float32),
        grid_spec=pltpu.PrefetchScalarGridSpec(
            num_scalar_prefetch=0,
            grid=(num_d, num_n),
            in_specs=[
                pl.BlockSpec((tile_n, tile_d), lambda i, j: (j, i)),
                pl.BlockSpec((tile_n, tile_d), lambda i, j: (j, i)),
            ],
            out_specs=pl.BlockSpec((1, tile_d), lambda i, j: (0, i)),
            scratch_shapes=[pltpu.VMEM((8, tile_d), jnp.float32)] * 5,
        ),
        compiler_params=pltpu.CompilerParams(
            dimension_semantics=("parallel", "arbitrary"),
            vmem_limit_bytes=32 * 1024 * 1024,
        ),
        cost_estimate=pl.CostEstimate(
            flops=8 * n * d,
            transcendentals=0,
            bytes_accessed=2 * n * d * itemsize + 4 * d_cols,
        ),
    )(x2, y2)

    # Feature lanes past the true D hold garbage r from the edge tile; slice
    # them away.  The tiny final mean / "1 - r" stays in the wrapper so the
    # grid remains fully parallel over feature tiles.
    return jnp.float32(1.0) - jnp.sum(r_row[0, :d]) / jnp.float32(d)


def _reference_loss(x, y):
    # Pure-JAX reference mirroring the PyTorch module exactly.
    x = x.astype(jnp.float32)
    y = y.astype(jnp.float32)
    n = x.shape[0]
    x_mean = jnp.mean(x, axis=0)
    y_mean = jnp.mean(y, axis=0)
    x_std = jnp.sqrt(jnp.sum((x - x_mean) ** 2, axis=0) / (n - 1))
    y_std = jnp.sqrt(jnp.sum((y - y_mean) ** 2, axis=0) / (n - 1))
    r = jnp.mean((x - x_mean) * (y - y_mean), axis=0) / (x_std * y_std + 1e-6)
    return 1.0 - jnp.mean(r)


if __name__ == "__main__":
    key = jax.random.PRNGKey(0)
    kx, ky = jax.random.split(key)

    # Case 1: batch=8, channels=4, spatial=16x16 (D=1024 -> two parallel
    # feature tiles for megacore; N divides the tile, no masking path).
    x = jax.random.normal(kx, (8, 4, 16, 16), dtype=jnp.float32)
    y = 0.7 * x + 0.3 * jax.random.normal(ky, (8, 4, 16, 16), dtype=jnp.float32)
    loss = imput_loss(x, y)
    jax.block_until_ready(loss)
    ref = _reference_loss(x, y)
    assert jnp.allclose(loss, ref, atol=1e-4, rtol=1e-4), (loss, ref)

    # Case 2: ragged N and D -> exercises the in-kernel edge-block row
    # masking and the wrapper-side feature-lane slice (no jnp.pad anywhere).
    x3 = jax.random.normal(kx, (10, 3, 7, 5), dtype=jnp.float32)
    y3 = 0.5 * x3 + 0.5 * jax.random.normal(ky, (10, 3, 7, 5), dtype=jnp.float32)
    loss3 = imput_loss(x3, y3)
    jax.block_until_ready(loss3)
    ref3 = _reference_loss(x3, y3)
    assert jnp.allclose(loss3, ref3, atol=1e-4, rtol=1e-4), (loss3, ref3)

    # Case 3: bf16 inputs + MXU column-sum offload (VALU-bound regime knobs).
    xb = jax.random.normal(kx, (16, 4, 16, 16), dtype=jnp.float32).astype(jnp.bfloat16)
    yb = (0.6 * xb.astype(jnp.float32)
          + 0.4 * jax.random.normal(ky, (16, 4, 16, 16), dtype=jnp.float32)
          ).astype(jnp.bfloat16)
    lossb = imput_loss(xb, yb, use_mxu_sums=True)
    jax.block_until_ready(lossb)
    refb = _reference_loss(xb, yb)
    assert jnp.allclose(lossb, refb, atol=1e-4, rtol=1e-4), (lossb, refb)

    print("KERNEL_OK")
</pallas_src>

<mosaic_0001>
module attributes {stable_mosaic.version = 11 : i64} {
  func.func @_imput_loss_kernel(%arg0: i32, %arg1: i32, %arg2: memref<8x512xf32, #tpu.memory_space<vmem>>, %arg3: memref<8x512xf32, #tpu.memory_space<vmem>>, %arg4: memref<1x512xf32, #tpu.memory_space<vmem>>, %arg5: memref<8x512xf32, #tpu.memory_space<vmem>>, %arg6: memref<8x512xf32, #tpu.memory_space<vmem>>, %arg7: memref<8x512xf32, #tpu.memory_space<vmem>>, %arg8: memref<8x512xf32, #tpu.memory_space<vmem>>, %arg9: memref<8x512xf32, #tpu.memory_space<vmem>>) attributes {dimension_semantics = [#tpu.dimension_semantics<parallel>, #tpu.dimension_semantics<arbitrary>], iteration_bounds = array<i64: 2, 1>, scalar_prefetch = 0 : i64, scratch_operands = 5 : i64, tpu.core_type = #tpu.core_type<tc>, window_params = [{transform_indices = @transform_0, window_bounds = array<i64: 8, 512>}, {transform_indices = @transform_1, window_bounds = array<i64: 8, 512>}, {transform_indices = @transform_2, window_bounds = array<i64: 1, 512>}]} {
    %c0_i32 = arith.constant 0 : i32
    %0 = arith.cmpi eq, %arg1, %c0_i32 : i32
    %1 = arith.extui %0 : i1 to i32
    %c0_i32_0 = arith.constant 0 : i32
    %2 = arith.cmpi ne, %1, %c0_i32_0 : i32
    scf.if %2 {
      %cst_30 = arith.constant 0.000000e+00 : f32
      %36 = vector.broadcast %cst_30 : f32 to vector<8x512xf32>
      %c0_31 = arith.constant 0 : index
      %c0_32 = arith.constant 0 : index
      %37 = vector.load %arg5[%c0_31, %c0_32] : memref<8x512xf32, #tpu.memory_space<vmem>>, vector<8x512xf32>
      tpu.vector_store %arg5[%c0_31, %c0_32], %36 {strides = array<i32>} : memref<8x512xf32, #tpu.memory_space<vmem>>, vector<8x512xf32>,
      %cst_33 = arith.constant 0.000000e+00 : f32
      %38 = vector.broadcast %cst_33 : f32 to vector<8x512xf32>
      %c0_34 = arith.constant 0 : index
      %c0_35 = arith.constant 0 : index
      %39 = vector.load %arg6[%c0_34, %c0_35] : memref<8x512xf32, #tpu.memory_space<vmem>>, vector<8x512xf32>
      tpu.vector_store %arg6[%c0_34, %c0_35], %38 {strides = array<i32>} : memref<8x512xf32, #tpu.memory_space<vmem>>, vector<8x512xf32>,
      %cst_36 = arith.constant 0.000000e+00 : f32
      %40 = vector.broadcast %cst_36 : f32 to vector<8x512xf32>
      %c0_37 = arith.constant 0 : index
      %c0_38 = arith.constant 0 : index
      %41 = vector.load %arg7[%c0_37, %c0_38] : memref<8x512xf32, #tpu.memory_space<vmem>>, vector<8x512xf32>
      tpu.vector_store %arg7[%c0_37, %c0_38], %40 {strides = array<i32>} : memref<8x512xf32, #tpu.memory_space<vmem>>, vector<8x512xf32>,
      %cst_39 = arith.constant 0.000000e+00 : f32
      %42 = vector.broadcast %cst_39 : f32 to vector<8x512xf32>
      %c0_40 = arith.constant 0 : index
      %c0_41 = arith.constant 0 : index
      %43 = vector.load %arg8[%c0_40, %c0_41] : memref<8x512xf32, #tpu.memory_space<vmem>>, vector<8x512xf32>
      tpu.vector_store %arg8[%c0_40, %c0_41], %42 {strides = array<i32>} : memref<8x512xf32, #tpu.memory_space<vmem>>, vector<8x512xf32>,
      %cst_42 = arith.constant 0.000000e+00 : f32
      %44 = vector.broadcast %cst_42 : f32 to vector<8x512xf32>
      %c0_43 = arith.constant 0 : index
      %c0_44 = arith.constant 0 : index
      %45 = vector.load %arg9[%c0_43, %c0_44] : memref<8x512xf32, #tpu.memory_space<vmem>>, vector<8x512xf32>
      tpu.vector_store %arg9[%c0_43, %c0_44], %44 {strides = array<i32>} : memref<8x512xf32, #tpu.memory_space<vmem>>, vector<8x512xf32>,
    } else {
    }
    %c0 = arith.constant 0 : index
    %c0_1 = arith.constant 0 : index
    %3 = vector.load %arg2[%c0, %c0_1] : memref<8x512xf32, #tpu.memory_space<vmem>>, vector<8x512xf32>
    %c0_2 = arith.constant 0 : index
    %c0_3 = arith.constant 0 : index
    %4 = vector.load %arg3[%c0_2, %c0_3] : memref<8x512xf32, #tpu.memory_space<vmem>>, vector<8x512xf32>
    %c0_4 = arith.constant 0 : index
    %c0_5 = arith.constant 0 : index
    %5 = vector.load %arg5[%c0_4, %c0_5] : memref<8x512xf32, #tpu.memory_space<vmem>>, vector<8x512xf32>
    %6 = vector.shape_cast %3 : vector<8x512xf32> to vector<1x8x512xf32>
    %cst = arith.constant dense<0.000000e+00> : vector<8x512xf32>
    %7 = vector.multi_reduction <add>, %6, %cst [0] : vector<1x8x512xf32> to vector<8x512xf32>
    %8 = arith.addf %5, %7 : vector<8x512xf32>
    %c0_6 = arith.constant 0 : index
    %c0_7 = arith.constant 0 : index
    %9 = vector.load %arg5[%c0_6, %c0_7] : memref<8x512xf32, #tpu.memory_space<vmem>>, vector<8x512xf32>
    tpu.vector_store %arg5[%c0_6, %c0_7], %8 {strides = array<i32>} : memref<8x512xf32, #tpu.memory_space<vmem>>, vector<8x512xf32>,
    %c0_8 = arith.constant 0 : index
    %c0_9 = arith.constant 0 : index
    %10 = vector.load %arg6[%c0_8, %c0_9] : memref<8x512xf32, #tpu.memory_space<vmem>>, vector<8x512xf32>
    %11 = vector.shape_cast %4 : vector<8x512xf32> to vector<1x8x512xf32>
    %cst_10 = arith.constant dense<0.000000e+00> : vector<8x512xf32>
    %12 = vector.multi_reduction <add>, %11, %cst_10 [0] : vector<1x8x512xf32> to vector<8x512xf32>
    %13 = arith.addf %10, %12 : vector<8x512xf32>
    %c0_11 = arith.constant 0 : index
    %c0_12 = arith.constant 0 : index
    %14 = vector.load %arg6[%c0_11, %c0_12] : memref<8x512xf32, #tpu.memory_space<vmem>>, vector<8x512xf32>
    tpu.vector_store %arg6[%c0_11, %c0_12], %13 {strides = array<i32>} : memref<8x512xf32, #tpu.memory_space<vmem>>, vector<8x512xf32>,
    %c0_13 = arith.constant 0 : index
    %c0_14 = arith.constant 0 : index
    %15 = vector.load %arg7[%c0_13, %c0_14] : memref<8x512xf32, #tpu.memory_space<vmem>>, vector<8x512xf32>
    %16 = arith.mulf %3, %4 : vector<8x512xf32>
    %17 = vector.shape_cast %16 : vector<8x512xf32> to vector<1x8x512xf32>
    %cst_15 = arith.constant dense<0.000000e+00> : vector<8x512xf32>
    %18 = vector.multi_reduction <add>, %17, %cst_15 [0] : vector<1x8x512xf32> to vector<8x512xf32>
    %19 = arith.addf %15, %18 : vector<8x512xf32>
    %c0_16 = arith.constant 0 : index
    %c0_17 = arith.constant 0 : index
    %20 = vector.load %arg7[%c0_16, %c0_17] : memref<8x512xf32, #tpu.memory_space<vmem>>, vector<8x512xf32>
    tpu.vector_store %arg7[%c0_16, %c0_17], %19 {strides = array<i32>} : memref<8x512xf32, #tpu.memory_space<vmem>>, vector<8x512xf32>,
    %c0_18 = arith.constant 0 : index
    %c0_19 = arith.constant 0 : index
    %21 = vector.load %arg8[%c0_18, %c0_19] : memref<8x512xf32, #tpu.memory_space<vmem>>, vector<8x512xf32>
    %22 = arith.mulf %3, %3 : vector<8x512xf32>
    %23 = vector.shape_cast %22 : vector<8x512xf32> to vector<1x8x512xf32>
    %cst_20 = arith.constant dense<0.000000e+00> : vector<8x512xf32>
    %24 = vector.multi_reduction <add>, %23, %cst_20 [0] : vector<1x8x512xf32> to vector<8x512xf32>
    %25 = arith.addf %21, %24 : vector<8x512xf32>
    %c0_21 = arith.constant 0 : index
    %c0_22 = arith.constant 0 : index
    %26 = vector.load %arg8[%c0_21, %c0_22] : memref<8x512xf32, #tpu.memory_space<vmem>>, vector<8x512xf32>
    tpu.vector_store %arg8[%c0_21, %c0_22], %25 {strides = array<i32>} : memref<8x512xf32, #tpu.memory_space<vmem>>, vector<8x512xf32>,
    %c0_23 = arith.constant 0 : index
    %c0_24 = arith.constant 0 : index
    %27 = vector.load %arg9[%c0_23, %c0_24] : memref<8x512xf32, #tpu.memory_space<vmem>>, vector<8x512xf32>
    %28 = arith.mulf %4, %4 : vector<8x512xf32>
    %29 = vector.shape_cast %28 : vector<8x512xf32> to vector<1x8x512xf32>
    %cst_25 = arith.constant dense<0.000000e+00> : vector<8x512xf32>
    %30 = vector.multi_reduction <add>, %29, %cst_25 [0] : vector<1x8x512xf32> to vector<8x512xf32>
    %31 = arith.addf %27, %30 : vector<8x512xf32>
    %c0_26 = arith.constant 0 : index
    %c0_27 = arith.constant 0 : index
    %32 = vector.load %arg9[%c0_26, %c0_27] : memref<8x512xf32, #tpu.memory_space<vmem>>, vector<8x512xf32>
    tpu.vector_store %arg9[%c0_26, %c0_27], %31 {strides = array<i32>} : memref<8x512xf32, #tpu.memory_space<vmem>>, vector<8x512xf32>,
    %c0_i32_28 = arith.constant 0 : i32
    %33 = arith.cmpi eq, %arg1, %c0_i32_28 : i32
    %34 = arith.extui %33 : i1 to i32
    %c0_i32_29 = arith.constant 0 : i32
    %35 = arith.cmpi ne, %34, %c0_i32_29 : i32
    scf.if %35 {
      %c0_30 = arith.constant 0 : index
      %c0_31 = arith.constant 0 : index
      %36 = vector.load %arg5[%c0_30, %c0_31] : memref<8x512xf32, #tpu.memory_space<vmem>>, vector<8x512xf32>
      %cst_32 = arith.constant dense<0.000000e+00> : vector<512xf32>
      %37 = vector.multi_reduction <add>, %36, %cst_32 [0] : vector<8x512xf32> to vector<512xf32>
      %38 = vector.shape_cast %37 : vector<512xf32> to vector<1x512xf32>
      %c0_33 = arith.constant 0 : index
      %c0_34 = arith.constant 0 : index
      %39 = vector.load %arg6[%c0_33, %c0_34] : memref<8x512xf32, #tpu.memory_space<vmem>>, vector<8x512xf32>
      %cst_35 = arith.constant dense<0.000000e+00> : vector<512xf32>
      %40 = vector.multi_reduction <add>, %39, %cst_35 [0] : vector<8x512xf32> to vector<512xf32>
      %41 = vector.shape_cast %40 : vector<512xf32> to vector<1x512xf32>
      %c0_36 = arith.constant 0 : index
      %c0_37 = arith.constant 0 : index
      %42 = vector.load %arg7[%c0_36, %c0_37] : memref<8x512xf32, #tpu.memory_space<vmem>>, vector<8x512xf32>
      %cst_38 = arith.constant dense<0.000000e+00> : vector<512xf32>
      %43 = vector.multi_reduction <add>, %42, %cst_38 [0] : vector<8x512xf32> to vector<512xf32>
      %44 = vector.shape_cast %43 : vector<512xf32> to vector<1x512xf32>
      %c0_39 = arith.constant 0 : index
      %c0_40 = arith.constant 0 : index
      %45 = vector.load %arg8[%c0_39, %c0_40] : memref<8x512xf32, #tpu.memory_space<vmem>>, vector<8x512xf32>
      %cst_41 = arith.constant dense<0.000000e+00> : vector<512xf32>
      %46 = vector.multi_reduction <add>, %45, %cst_41 [0] : vector<8x512xf32> to vector<512xf32>
      %47 = vector.shape_cast %46 : vector<512xf32> to vector<1x512xf32>
      %c0_42 = arith.constant 0 : index
      %c0_43 = arith.constant 0 : index
      %48 = vector.load %arg9[%c0_42, %c0_43] : memref<8x512xf32, #tpu.memory_space<vmem>>, vector<8x512xf32>
      %cst_44 = arith.constant dense<0.000000e+00> : vector<512xf32>
      %49 = vector.multi_reduction <add>, %48, %cst_44 [0] : vector<8x512xf32> to vector<512xf32>
      %50 = vector.shape_cast %49 : vector<512xf32> to vector<1x512xf32>
      %cst_45 = arith.constant 8.000000e+00 : f32
      %51 = vector.broadcast %cst_45 : f32 to vector<1x512xf32>
      %52 = arith.divf %38, %51 : vector<1x512xf32>
      %cst_46 = arith.constant 8.000000e+00 : f32
      %53 = vector.broadcast %cst_46 : f32 to vector<1x512xf32>
      %54 = arith.divf %41, %53 : vector<1x512xf32>
      %cst_47 = arith.constant 8.000000e+00 : f32
      %55 = vector.broadcast %cst_47 : f32 to vector<1x512xf32>
      %56 = arith.divf %44, %55 : vector<1x512xf32>
      %57 = arith.mulf %52, %54 : vector<1x512xf32>
      %58 = arith.subf %56, %57 : vector<1x512xf32>
      %cst_48 = arith.constant 8.000000e+00 : f32
      %59 = vector.broadcast %cst_48 : f32 to vector<1x512xf32>
      %60 = arith.mulf %59, %52 : vector<1x512xf32>
      %61 = arith.mulf %60, %52 : vector<1x512xf32>
      %62 = arith.subf %47, %61 : vector<1x512xf32>
      %cst_49 = arith.constant 8.000000e+00 : f32
      %cst_50 = arith.constant 1.000000e+00 : f32
      %63 = arith.subf %cst_49, %cst_50 : f32
      %64 = vector.broadcast %63 : f32 to vector<1x512xf32>
      %65 = arith.divf %62, %64 : vector<1x512xf32>
      %cst_51 = arith.constant 8.000000e+00 : f32
      %66 = vector.broadcast %cst_51 : f32 to vector<1x512xf32>
      %67 = arith.mulf %66, %54 : vector<1x512xf32>
      %68 = arith.mulf %67, %54 : vector<1x512xf32>
      %69 = arith.subf %50, %68 : vector<1x512xf32>
      %cst_52 = arith.constant 8.000000e+00 : f32
      %cst_53 = arith.constant 1.000000e+00 : f32
      %70 = arith.subf %cst_52, %cst_53 : f32
      %71 = vector.broadcast %70 : f32 to vector<1x512xf32>
      %72 = arith.divf %69, %71 : vector<1x512xf32>
      %cst_54 = arith.constant 0.000000e+00 : f32
      %73 = vector.broadcast %cst_54 : f32 to vector<1x512xf32>
      %74 = arith.maximumf %65, %73 : vector<1x512xf32>
      %75 = math.sqrt %74 : vector<1x512xf32>
      %cst_55 = arith.constant 0.000000e+00 : f32
      %76 = vector.broadcast %cst_55 : f32 to vector<1x512xf32>
      %77 = arith.maximumf %72, %76 : vector<1x512xf32>
      %78 = math.sqrt %77 : vector<1x512xf32>
      %79 = arith.mulf %75, %78 : vector<1x512xf32>
      %cst_56 = arith.constant 9.99999997E-7 : f32
      %80 = vector.broadcast %cst_56 : f32 to vector<1x512xf32>
      %81 = arith.addf %79, %80 : vector<1x512xf32>
      %82 = arith.divf %58, %81 : vector<1x512xf32>
      %c0_57 = arith.constant 0 : index
      %c0_58 = arith.constant 0 : index
      %83 = vector.load %arg4[%c0_57, %c0_58] : memref<1x512xf32, #tpu.memory_space<vmem>>, vector<1x512xf32>
      tpu.vector_store %arg4[%c0_57, %c0_58], %82 {strides = array<i32>} : memref<1x512xf32, #tpu.memory_space<vmem>>, vector<1x512xf32>,
    } else {
    }
    return
  }
  func.func @transform_0(%arg0: i32, %arg1: i32) -> (i32, i32) {
    %c0_i32 = arith.constant 0 : i32
    return %arg1, %arg0 : i32, i32
  }
  func.func @transform_1(%arg0: i32, %arg1: i32) -> (i32, i32) {
    %c0_i32 = arith.constant 0 : i32
    return %arg1, %arg0 : i32, i32
  }
  func.func @transform_2(%arg0: i32, %arg1: i32) -> (i32, i32) {
    %c0_i32 = arith.constant 0 : i32
    %c0_i32_0 = arith.constant 0 : i32
    return %c0_i32, %arg0 : i32, i32
  }
}

</mosaic_0001>

<bundles_post_ra>
// kernel: tpu_custom_call.1
= control target key start
LH: loop header
LB: loop body
LE: loop exit
PB: predicated region body
PF: predicated region fallthrough
CT: control target
= control target key end

     0   :  { %7 = vsyncpa [#allocation8], 0  ;;  %s1456_s0 = inlined_call_operand.hbm [shape: f32[8,1024], index: 0, kind: input, shape index: {}]   ;;  %s1457_s1 = inlined_call_operand.hbm [shape: f32[8,1024], index: 1, kind: input, shape index: {}]   ;;  %s1458_s2 = inlined_call_operand.hbm [shape: f32[1,1024], index: 2, kind: output, shape index: {}]  }
   0x1   :  { %9 = vsyncpa [#allocation8 + $0x1], 0 }
   0x2   :  { %10 = vsyncpa [#allocation11], 0 }
   0x3   :  { %12 = vsyncpa [#allocation11 + $0x1], 0 }
   0x4   :  { %13 = vsyncpa [#allocation9], 0 }
   0x5   :  { %15 = vsyncpa [#allocation9 + $0x1], 0  ;;  %s1059_s9 = smov 0   ;;  %s1061_s10 = smov 0  }
   0x6   :  { %s1063_s11 = smov 0   ;;  %s1065_s12 = smov 0  }
   0x7   :  { %s1067_s13 = smov 0   ;;  %s1069_s14 = smov 0  }
   0x8 LB: > { %s778_s15 = sadd.s32 4294967295, %s1038_s14   ;;  %s779_s16 = sadd.s32 4294967294, %s1038_s14   ;;  %s1038_s14 = sphi %s1069_s14, %s21_s14   ;;  %s1034_s13 = sphi %s1067_s13, %s1478_s13   ;;  %s1030_s12 = sphi %s1065_s12, %s1477_s12   ;;  %s1026_s11 = sphi %s1063_s11, %s1476_s11   ;;  %s1022_s10 = sphi %s1061_s10, %s1475_s10   ;;  %s1018_s9 = sphi %s1059_s9, %s1474_s9  }
   0x9   : > { %s33_s17 = sadd.s32 1, %s1034_s13  ;;  %s42_s18 = sadd.s32 1, %s1026_s11 }
   0xa   : > { %p35_p0 = scmp.ge.s32.totalorder %s33_s17, 2  ;;  %p49_p1 = scmp.ne.s32.totalorder %s1026_s11, %s1022_s10 }
   0xb   : > { %p50_p2 = scmp.eq.s32.totalorder %s1038_s14, 0  ;;  %p55_p3 = scmp.ne.s32.totalorder %s1022_s10, %s1018_s9 }
   0xc   : > { %s1480_s17 = smov (%p35_p0, %s33_s17), 0  ;;  %p56_p5 = scmp.eq.s32.totalorder %s778_s15, 0 }
   0xd   : > { %p1100_p4 = por %p50_p2, %p49_p1  ;;  %s38_s20 = ssub.s32 %s1034_s13, %s1480_s17 }
   0xe   : > { %p107_p6 = scmp.eq.s32.totalorder %s778_s15, 1  ;;  %p40_p7 = scmp.eq.s32.totalorder %s38_s20, 0 }
   0xf   : > { %p1106_p8 = por %p56_p5, %p55_p3  ;;  %p113_p10 = scmp.eq.s32.totalorder %s779_s16, 1 }
  0x10   : > { %p1110_p9 = por %p107_p6, %p49_p1  ;;  %p817_p13 = scmp.lt.s32.totalorder %s1038_s14, 2 }
  0x11   : > { %s1462_s21 = scalar_select %p1106_p8, 1, 0 }
  0x12   : > { %s1463_s22 = scalar_select %p1110_p9, 1, 0 }
  0x13   : > { %s1115_s23 = scalar_select %p40_p7, %s1026_s11, %s42_s18  }
  0x14   : > { %p1117_p11 = por %p113_p10, %p55_p3  ;;  %s1124_s25 = sand.u32 1, %s1026_s11  }
  0x15   : > { %s782_s26 = sshll.u32 %s1124_s25, 5  ;;  %s797_s27 = sshll.u32 %s1034_s13, 9 }
  0x16   : > { %s1464_s24 = scalar_select %p1117_p11, 1, 0 }
  0x17   : > { %s1133_s30 = scalar_lea.hbm %s1456_s0, %s797_s27  ;;  %s137_s3 = scalar_lea.vmem [#allocation7], %s782_s26 }
  0x18   : > { %s147_s4 = sshll.u32 %s137_s3, 4  ;;  %p1141_p0 = pnand %p817_p13, %p1100_p4  ;;  %s1137_s4 = int_to_ptr.vmem [resolvable:$true] %s147_s4 }
  0x19   : > { %s134_s6 = scalar_lea.sflag [#allocation8], %s1124_s25  ;;  %s892_s7 = scalar_lea.hbm %s1133_s30, 512 }
  0x1a   : > { %p893_p3 = scmp.ne.s32.totalorder %s1133_s30, %s892_s7  ;;  %p894_p5 = pneg %p1141_p0 }
  0x1b   : > { %s897_s16 = scalar_lea.hbm %s1456_s0, 1024  ;;  %p898_p4 = scmp.lt.u32.totalorder %s1133_s30, %s1456_s0 }
  0x1c   : > { %p895_p6 = pnand %p894_p5, %p893_p3  ;;  %p899_p10 = scmp.lt.u32.totalorder %s897_s16, %s892_s7 }
  0x1d   : > { %p901_p12 = scmp.lt.u32.totalorder %s892_s7, %s1133_s30 }
  0x1e   : > { %p896_p7 = pneg %p895_p6  ;;  %p900_p13 = por %p899_p10, %p898_p4 }
  0x20   : > { %p902_p1 = por %p901_p12, %p900_p13 }
  0x22   : > { %p903_p2 = pnand %p902_p1, %p896_p7 }
  0x24   : > { %906 = shalt.err (!%p903_p2)
}
  0x25   : > { %s907_s20 = scalar_lea.vmem %s1137_s4, 512  ;;  %s1040_s28 = smov [#allocation7]  }
  0x26   : > { %p908_p3 = scmp.ne.s32.totalorder %s1137_s4, %s907_s20  ;;  %s912_s29 = sshll.u32 %s1040_s28, 4  ;;  %s913_s29 = int_to_ptr.vmem [resolvable:$false] %s912_s29 }
  0x27   : > { %s914_s3 = scalar_lea.vmem %s913_s29, 1024  ;;  %p915_p9 = scmp.lt.s32.totalorder %s1137_s4, %s913_s29 }
  0x28   : > { %p910_p6 = pnand %p908_p3, %p894_p5  ;;  %p916_p4 = scmp.lt.s32.totalorder %s914_s3, %s907_s20 }
  0x2a   : > { %p911_p11 = pneg %p910_p6  ;;  %p917_p10 = por %p916_p4, %p915_p9 }
  0x2c   : > { %p918_p12 = pnand %p917_p10, %p911_p11 }
  0x2e   : > { %921 = shalt.err (!%p918_p12)
}
  0x2f   : > { %809 = dma.hbm_to_vmem [thread:$0]  (!%p1141_p0), %s1133_s30, 512, %s1137_s4, %s134_s6  }
  0x30   : > { %p1466_p1 = scmp.lt.s32.totalorder %s1038_s14, 3  ;;  %p1467_p2 = scmp.ge.s32.totalorder %s1038_s14, 1 }
  0x31   : > { %s1186_s16 = scalar_lea.hbm %s1457_s1, %s797_s27  ;;  %s158_s18 = scalar_lea.vmem [#allocation10], %s782_s26 }
  0x32   : > { %p1177_p7 = pnand %p1467_p2, %p1466_p1  ;;  %s168_s19 = sshll.u32 %s158_s18, 4  ;;  %s169_s19 = int_to_ptr.vmem [resolvable:$true] %s168_s19 }
  0x33   : > { %s155_s30 = scalar_lea.sflag [#allocation11], %s1124_s25  ;;  %s922_s4 = scalar_lea.hbm %s1186_s16, 512 }
  0x34   : > { %s1468_s7 = scalar_select %p1177_p7, 1, 0 }
  0x35   : > { %p923_p9 = scmp.ne.s32.totalorder %s1186_s16, %s922_s4  ;;  %s927_s27 = scalar_lea.hbm %s1457_s1, 1024 }
  0x36   : > { %p928_p3 = scmp.lt.u32.totalorder %s1186_s16, %s1457_s1  ;;  %p929_p6 = scmp.lt.u32.totalorder %s927_s27, %s922_s4 }
  0x37   : > { %p925_p11 = pnand %p923_p9, %p894_p5  ;;  %p931_p10 = scmp.lt.u32.totalorder %s922_s4, %s1186_s16 }
  0x38   : > { %p930_p4 = por %p929_p6, %p928_p3 }
  0x39   : > { %p926_p13 = pneg %p925_p11 }
  0x3a   : > { %p932_p12 = por %p931_p10, %p930_p4 }
  0x3c   : > { %p933_p1 = pnand %p932_p12, %p926_p13 }
  0x3e   : > { %936 = shalt.err (!%p933_p1)
}
  0x3f   : > { %s937_s25 = scalar_lea.vmem %s169_s19, 512  ;;  %s1041_s26 = smov [#allocation10]  }
  0x40   : > { %p938_p2 = scmp.ne.s32.totalorder %s169_s19, %s937_s25  ;;  %s942_s3 = sshll.u32 %s1041_s26, 4  ;;  %s943_s3 = int_to_ptr.vmem [resolvable:$false] %s942_s3 }
  0x41   : > { %s944_s8 = scalar_lea.vmem %s943_s3, 1024  ;;  %p945_p8 = scmp.lt.s32.totalorder %s169_s19, %s943_s3 }
  0x42   : > { %p940_p9 = pnand %p938_p2, %p894_p5  ;;  %p946_p7 = scmp.lt.s32.totalorder %s944_s8, %s937_s25 }
  0x44   : > { %p941_p11 = pneg %p940_p9  ;;  %p947_p3 = por %p946_p7, %p945_p8 }
  0x46   : > { %p948_p6 = pnand %p947_p3, %p941_p11 }
  0x48   : > { %951 = shalt.err (!%p948_p6)
}
  0x49   : > { %812 = dma.hbm_to_vmem [thread:$0]  (!%p1141_p0), %s1186_s16, 512, %s169_s19, %s155_s30  }
  0x4a   : > { %p1469_p13 = scmp.ne.s32.totalorder %s1468_s7, 0 }
  0x4b   : > { %s1213_s15 = sand.u32 (!%p1469_p13), 1, %s1022_s10   ;;  %p1470_p5 = scmp.ne.s32.totalorder (!%p1469_p13), %s1462_s21, 0 }
  0x4c   : > { %177 = sbr.rel (%p1469_p13) target bundleno = 188 (0xbc), region = 28  ;;  %s789_s18 = sshll.u32 (!%p1469_p13), %s1213_s15, 5 }
  0x4d   : > { %s180_s4 = scalar_lea.sflag (!%p1469_p13), [#allocation8], %s1213_s15  ;;  %s183_s6 = scalar_lea.vmem (!%p1469_p13), [#allocation7], %s789_s18 }
  0x53   : > { %1005 = dma.done.wait (%p1470_p5), %s180_s4, 512  }
  0x54   : > { %1007 = vsyncadd (%p1470_p5), %s180_s4, 4294966784  ;;  %s189_s5 = scalar_lea.sflag [#allocation11], %s1213_s15  ;;  %s192_s16 = scalar_lea.vmem [#allocation10], %s789_s18 }
  0x55   : > { %1009 = dma.done.wait (%p1470_p5), %s189_s5, 512  }
  0x56   : > { %1011 = vsyncadd (%p1470_p5), %s189_s5, 4294966784  ;;  %v245_v0 = vld [vmem:[%s183_s6] sm:$0xff]  ;;  %v246_v1 = vld [vmem:[%s183_s6 + $0x8] sm:$0xff]  ;;  %s791_s21 = sshll.u32 %s1213_s15, 2  ;;  %s799_s7 = sshll.u32 %s1030_s12, 6 }
  0x57   : > { %v247_v2 = vld [vmem:[%s183_s6 + $0x10] sm:$0xff]  ;;  %v248_v3 = vld [vmem:[%s183_s6 + $0x18] sm:$0xff]  ;;  %v249_v4 = vld [vmem:[%s192_s16] sm:$0xff]  ;;  %v352_v8 = vrot.slane %v245_v0, 4  ;;  %v358_v9 = vrot.slane %v246_v1, 4  ;;  %v309_v27 = vmul.f32 %v245_v0, %v245_v0  ;;  %v310_v28 = vmul.f32 %v246_v1, %v246_v1  ;;  %s217_s19 = scalar_lea.vmem [#allocation12], %s791_s21  ;;  %s1407_s28 = scalar_lea.hbm %s1458_s2, %s799_s7 }
  0x58   : > { %v250_v5 = vld [vmem:[%s192_s16 + $0x8] sm:$0xff]  ;;  %v251_v6 = vld [vmem:[%s192_s16 + $0x10] sm:$0xff]  ;;  %v252_v7 = vld [vmem:[%s192_s16 + $0x18] sm:$0xff]  ;;  %v364_v10 = vrot.slane %v247_v2, 4  ;;  %v370_v11 = vrot.slane %v248_v3, 4  ;;  %v380_v12 = vrot.slane %v249_v4, 4  ;;  %v311_v29 = vmul.f32 %v247_v2, %v247_v2 }
  0x59   : > { %v386_v13 = vrot.slane %v250_v5, 4  ;;  %v392_v14 = vrot.slane %v251_v6, 4  ;;  %v398_v15 = vrot.slane %v252_v7, 4  ;;  %v353_v16 = vadd.f32 %v352_v8, %v245_v0  ;;  %s671_s30 = sshll.u32 %s217_s19, 4  ;;  %s657_s29 = scalar_lea.sflag [#allocation9], %s1213_s15  ;;  %s1409_s30 = int_to_ptr.vmem [resolvable:$true] %s671_s30 }
  0x5a   : > { %v359_v17 = vadd.f32 %v358_v9, %v246_v1  ;;  %v365_v18 = vadd.f32 %v364_v10, %v247_v2  ;;  %v371_v19 = vadd.f32 %v370_v11, %v248_v3  ;;  %v381_v20 = vadd.f32 %v380_v12, %v249_v4  ;;  %s952_s25 = scalar_lea.vmem %s1409_s30, 64  ;;  %p1471_p0 = scmp.ne.s32.totalorder %s1463_s22, 0 }
  0x5b   : > { %v387_v21 = vadd.f32 %v386_v13, %v250_v5  ;;  %v393_v22 = vadd.f32 %v392_v14, %v251_v6  ;;  %v399_v23 = vadd.f32 %v398_v15, %v252_v7  ;;  %v354_v24 = vrot.slane %v353_v16, 2  ;;  %p953_p8 = scmp.ne.s32.totalorder %s1409_s30, %s952_s25  ;;  %s1043_s12 = smov [#allocation12]  }
  0x5c   : > { %v360_v25 = vrot.slane %v359_v17, 2  ;;  %v366_v26 = vrot.slane %v365_v18, 2  ;;  %v372_v30 = vrot.slane %v371_v19, 2  ;;  %v312_v31 = vmul.f32 %v248_v3, %v248_v3  ;;  %s956_s26 = sshll.u32 %s1043_s12, 4  ;;  %s957_s26 = int_to_ptr.vmem [resolvable:$false] %s956_s26 }
  0x5d   : > { %v382_v32 = vrot.slane %v381_v20, 2  ;;  %v388_v33 = vrot.slane %v387_v21, 2  ;;  %v394_v34 = vrot.slane %v393_v22, 2  ;;  %v289_v35 = vmul.f32 %v249_v4, %v245_v0  ;;  %p954_p7 = pnand %p953_p8, %p1471_p0  ;;  %s958_s3 = scalar_lea.vmem %s957_s26, 128 }
  0x5e   : > { %v290_v36 = vmul.f32 %v250_v5, %v246_v1  ;;  %v400_v37 = vrot.slane %v399_v23, 2  ;;  %v329_v38 = vmul.f32 %v249_v4, %v249_v4  ;;  %v355_v39 = vadd.f32 %v354_v24, %v353_v16  ;;  %p959_p10 = scmp.lt.s32.totalorder %s1409_s30, %s957_s26  ;;  %p960_p12 = scmp.lt.s32.totalorder %s958_s3, %s952_s25 }
  0x5f   : > { %v361_v40 = vadd.f32 %v360_v25, %v359_v17  ;;  %v367_v41 = vadd.f32 %v366_v26, %v365_v18  ;;  %v373_v42 = vadd.f32 %v372_v30, %v371_v19  ;;  %v436_v43 = vrot.slane %v309_v27, 4  ;;  %p955_p4 = pneg %p954_p7 }
  0x60   : > { %v442_v44 = vrot.slane %v310_v28, 4  ;;  %v448_v45 = vrot.slane %v311_v29, 4  ;;  %v383_v46 = vadd.f32 %v382_v32, %v381_v20  ;;  %v389_v47 = vadd.f32 %v388_v33, %v387_v21  ;;  %p961_p1 = por %p960_p12, %p959_p10 }
  0x61   : > { %v395_v48 = vadd.f32 %v394_v34, %v393_v22  ;;  %v454_v49 = vrot.slane %v312_v31, 4  ;;  %v401_v50 = vadd.f32 %v400_v37, %v399_v23  ;;  %v437_v51 = vadd.f32 %v436_v43, %v309_v27 }
  0x62   : > { %v443_v52 = vadd.f32 %v442_v44, %v310_v28  ;;  %v449_v53 = vadd.f32 %v448_v45, %v311_v29  ;;  %v1226_v54 = vmul.f32 %v251_v6, %v247_v2  ;;  %v356_v55 = vrot.slane %v355_v39, 1  ;;  %p962_p2 = pnand %p961_p1, %p955_p4 }
  0x63   : > { %v362_v56 = vrot.slane %v361_v40, 1  ;;  %v455_v57 = vadd.f32 %v454_v49, %v312_v31  ;;  %v1228_v58 = vmul.f32 %v252_v7, %v248_v3  ;;  %v368_v59 = vrot.slane %v367_v41, 1 }
  0x64   : > { %v438_v60 = vrot.slane %v437_v51, 2  ;;  %v444_v61 = vrot.slane %v443_v52, 2  ;;  %v330_v62 = vmul.f32 %v250_v5, %v250_v5  ;;  %v374_v63 = vrot.slane %v373_v42, 1 }
  0x65   : > { %v384_v0 = vrot.slane %v383_v46, 1  ;;  %v390_v1 = vrot.slane %v389_v47, 1  ;;  %v331_v4 = vmul.f32 %v251_v6, %v251_v6  ;;  %v396_v8 = vrot.slane %v395_v48, 1 }
  0x66   : > { %v402_v9 = vrot.slane %v401_v50, 1  ;;  %v450_v10 = vrot.slane %v449_v53, 2  ;;  %v332_v11 = vmul.f32 %v252_v7, %v252_v7  ;;  %v357_v12 = vadd.f32 %v356_v55, %v355_v39 }
  0x67   : > { %v363_v2 = vadd.f32 %v362_v56, %v361_v40  ;;  %v456_v13 = vrot.slane %v455_v57, 2  ;;  %v369_v14 = vadd.f32 %v368_v59, %v367_v41  ;;  %v408_v15 = vrot.slane %v289_v35, 4 }
  0x68   : > { %v439_v16 = vadd.f32 %v438_v60, %v437_v51  ;;  %v445_v3 = vadd.f32 %v444_v61, %v443_v52  ;;  %v375_v17 = vadd.f32 %v374_v63, %v373_v42  ;;  %v385_v18 = vadd.f32 %v384_v0, %v383_v46 }
  0x69   : > { %v391_v19 = vadd.f32 %v390_v1, %v389_v47  ;;  %v464_v20 = vrot.slane %v329_v38, 4  ;;  %v397_v5 = vadd.f32 %v396_v8, %v395_v48  ;;  %v403_v21 = vadd.f32 %v402_v9, %v401_v50 }
  0x6a   : > { %v414_v22 = vrot.slane %v290_v36, 4  ;;  %v451_v23 = vadd.f32 %v450_v10, %v449_v53  ;;  %v457_v6 = vadd.f32 %v456_v13, %v455_v57  ;;  %v470_v25 = vrot.slane %v330_v62, 4 }
  0x6b   : > { %v465_v24 = vadd.f32 %v464_v20, %v329_v38  ;;  %v476_v26 = vrot.slane %v331_v4, 4  ;;  %v1230_v7 = vadd.f32 %v408_v15, %v289_v35  ;;  %v440_v27 = vrot.slane %v439_v16, 1 }
  0x6c   : > { %v446_v28 = vrot.slane %v445_v3, 1  ;;  %v482_v29 = vrot.slane %v332_v11, 4  ;;  %v420_v30 = vrot.slane %v1226_v54, 4  ;;  %v471_v32 = vadd.f32 %v470_v25, %v330_v62 }
  0x6d   : > { %v466_v31 = vrot.slane %v465_v24, 2  ;;  %v477_v33 = vadd.f32 %v476_v26, %v331_v4  ;;  %v1233_v34 = vadd.f32 %v414_v22, %v290_v36  ;;  %v426_v37 = vrot.slane %v1228_v58, 4 }
  0x6e   : > { %v452_v39 = vrot.slane %v451_v23, 1  ;;  %v483_v40 = vadd.f32 %v482_v29, %v332_v11  ;;  %v458_v41 = vrot.slane %v457_v6, 1  ;;  %v472_v42 = vrot.slane %v471_v32, 2 }
  0x6f   : > { %v467_v38 = vadd.f32 %v466_v31, %v465_v24  ;;  %v478_v43 = vrot.slane %v477_v33, 2  ;;  %v441_v35 = vadd.f32 %v440_v27, %v439_v16  ;;  %v447_v44 = vadd.f32 %v446_v28, %v445_v3 }
  0x70   : > { %v484_v45 = vrot.slane %v483_v40, 2  ;;  %v1236_v46 = vmul.f32 0.125, %v357_v12  ;;  %v473_v48 = vadd.f32 %v472_v42, %v471_v32  ;;  %v1238_v50 = vmul.f32 0.125, %v363_v2 }
  0x71   : > { %v468_v47 = vrot.slane %v467_v38, 1  ;;  %v479_v49 = vadd.f32 %v478_v43, %v477_v33  ;;  %v1240_v51 = vmul.f32 0.125, %v369_v14  ;;  %v1242_v52 = vmul.f32 0.125, %v375_v17 }
  0x72   : > { %v485_v36 = vadd.f32 %v484_v45, %v483_v40  ;;  %v1244_v53 = vmul.f32 0.125, %v385_v18  ;;  %v474_v55 = vrot.slane %v473_v48, 1  ;;  %v1246_v57 = vmul.f32 0.125, %v391_v19 }
  0x73   : > { %v480_v56 = vrot.slane %v479_v49, 1  ;;  %v1248_v59 = vmul.f32 0.125, %v397_v5  ;;  %v453_v60 = vadd.f32 %v452_v39, %v451_v23  ;;  %v459_v61 = vadd.f32 %v458_v41, %v457_v6 }
  0x74   : > { %v486_v62 = vrot.slane %v485_v36, 1  ;;  %v1250_v63 = vmul.f32 0.125, %v403_v21  ;;  %v469_v0 = vadd.f32 %v468_v47, %v467_v38  ;;  %v475_v1 = vadd.f32 %v474_v55, %v473_v48 }
  0x75   : > { %v481_v4 = vadd.f32 %v480_v56, %v479_v49  ;;  %v509_v8 = vmul.f32 8.0, %v1236_v46  ;;  %v510_v10 = vmul.f32 8.0, %v1238_v50  ;;  %v511_v11 = vmul.f32 8.0, %v1240_v51 }
  0x76   : > { %v487_v9 = vadd.f32 %v486_v62, %v485_v36  ;;  %v512_v12 = vmul.f32 8.0, %v1242_v52  ;;  %v526_v13 = vmul.f32 8.0, %v1244_v53  ;;  %v527_v14 = vmul.f32 8.0, %v1246_v57 }
  0x77   : > { %v513_v2 = vmul.f32 %v509_v8, %v1236_v46  ;;  %v528_v15 = vmul.f32 8.0, %v1248_v59  ;;  %v514_v16 = vmul.f32 %v510_v10, %v1238_v50  ;;  %v515_v3 = vmul.f32 %v511_v11, %v1240_v51 }
  0x78   : > { %v516_v17 = vmul.f32 %v512_v12, %v1242_v52  ;;  %v529_v18 = vmul.f32 8.0, %v1250_v63  ;;  %v530_v20 = vmul.f32 %v526_v13, %v1244_v53  ;;  %v531_v5 = vmul.f32 %v527_v14, %v1246_v57 }
  0x79   : > { %v517_v19 = vsub.f32 %v441_v35, %v513_v2  ;;  %v532_v21 = vmul.f32 %v528_v15, %v1248_v59  ;;  %v518_v22 = vsub.f32 %v447_v44, %v514_v16  ;;  %v519_v23 = vsub.f32 %v453_v60, %v515_v3 }
  0x7a   : > { %v520_v6 = vsub.f32 %v459_v61, %v516_v17  ;;  %v533_v24 = vmul.f32 %v529_v18, %v1250_v63  ;;  %v534_v26 = vsub.f32 %v469_v0, %v530_v20  ;;  %v535_v27 = vsub.f32 %v475_v1, %v531_v5 }
  0x7b   : > { %v522_v25 = vmul.f32 0.14285715, %v517_v19  ;;  %v536_v28 = vsub.f32 %v481_v4, %v532_v21  ;;  %v523_v29 = vmul.f32 0.14285715, %v518_v22  ;;  %v524_v31 = vmul.f32 0.14285715, %v519_v23 }
  0x7c   : > { %v525_v32 = vmul.f32 0.14285715, %v520_v6  ;;  %v537_v33 = vsub.f32 %v487_v9, %v533_v24  ;;  %v538_v39 = vmul.f32 0.14285715, %v534_v26  ;;  %v539_v40 = vmul.f32 0.14285715, %v535_v27 }
  0x7d   : > { %v540_v41 = vmul.f32 0.14285715, %v536_v28  ;;  %v1268_v38 = vmax.f32 %v522_v25, 0.0  ;;  %v1270_v42 = vmax.f32 %v523_v29, 0.0  ;;  %v1272_v43 = vmax.f32 %v524_v31, 0.0 }
  0x7e   : > { %v410_v35 = vrot.slane %v1230_v7, 2  ;;  %v421_v44 = vadd.f32 %v420_v30, %v1226_v54  ;;  %v427_v45 = vadd.f32 %v426_v37, %v1228_v58  ;;  %v1281_v47 = vmax.f32 %v525_v32, 0.0 }
  0x7f   : > { %v416_v48 = vrot.slane %v1233_v34, 2  ;;  %v541_v49 = vmul.f32 0.14285715, %v537_v33  ;;  %868 = vrsqrt.f32 %v1268_v38  ;;  %v1285_v36 = vmax.f32 %v538_v39, 0.0 }
  0x80   : > { %870 = vrsqrt.f32 %v1270_v42  ;;  %v1288_v55 = vmax.f32 %v539_v40, 0.0  ;;  %v1291_v54 = vmax.f32 %v540_v41, 0.0  ;;  %v1294_v30 = vadd.f32 %v410_v35, %v1230_v7 }
  0x81   : > { %872 = vrsqrt.f32 %v1272_v43  ;;  %v422_v58 = vrot.slane %v421_v44, 2  ;;  %v1298_v37 = vadd.f32 %v416_v48, %v1233_v34  ;;  %v428_v56 = vrot.slane %v427_v45, 2 }
  0x82   : > { %874 = vrsqrt.f32 %v1281_v47  ;;  %v1300_v60 = vmax.f32 %v541_v49, 0.0  ;;  %v412_v61 = vrot.slane %v1294_v30, 1  ;;  %vm548_vm0 = vcmp.eq.f32.partialorder %v1268_v38, inf }
  0x83   : > { %876 = vrsqrt.f32 %v1285_v36  ;;  %v1306_v62 = vadd.f32 %v422_v58, %v421_v44  ;;  %v418_v7 = vrot.slane %v1298_v37, 1  ;;  %v1310_v0 = vadd.f32 %v428_v56, %v427_v45 }
  0x84   : > { %878 = vrsqrt.f32 %v1288_v55  ;;  %vm550_vm1 = vcmp.eq.f32.partialorder %v1268_v38, 0.0  ;;  %v551_v34 = vand.u32 2147483648, %v1268_v38  ;;  %vm555_vm2 = vcmp.eq.f32.partialorder %v1270_v42, inf }
  0x85   : > { %880 = vrsqrt.f32 %v1291_v54  ;;  %vm557_vm3 = vcmp.eq.f32.partialorder %v1270_v42, 0.0  ;;  %v558_v1 = vand.u32 2147483648, %v1270_v42  ;;  %vm562_vm4 = vcmp.eq.f32.partialorder %v1272_v43, inf }
  0x86   : > { %882 = vrsqrt.f32 %v1300_v60  ;;  %vm564_vm5 = vcmp.eq.f32.partialorder %v1272_v43, 0.0  ;;  %v565_v8 = vand.u32 2147483648, %v1272_v43  ;;  %vm569_vm6 = vcmp.eq.f32.partialorder %v1281_v47, inf }
  0x87   : > { %vm571_vm7 = vcmp.eq.f32.partialorder %v1281_v47, 0.0  ;;  %v572_v11 = vand.u32 2147483648, %v1281_v47  ;;  %vm580_vm8 = vcmp.eq.f32.partialorder %v1285_v36, inf  ;;  %vm582_vm9 = vcmp.eq.f32.partialorder %v1285_v36, 0.0 }
  0x88   : > { %v583_v13 = vand.u32 2147483648, %v1285_v36  ;;  %vm587_vm10 = vcmp.eq.f32.partialorder %v1288_v55, inf  ;;  %vm589_vm11 = vcmp.eq.f32.partialorder %v1288_v55, 0.0  ;;  %v590_v3 = vand.u32 2147483648, %v1288_v55 }
  0x89   : > { %v869_v4 = vpop.eup %868  ;;  %vm594_vm12 = vcmp.eq.f32.partialorder %v1291_v54, inf  ;;  %vm596_vm13 = vcmp.eq.f32.partialorder %v1291_v54, 0.0  ;;  %v597_v22 = vand.u32 2147483648, %v1291_v54  ;;  %vm601_vm14 = vcmp.eq.f32.partialorder %v1300_v60, inf }
  0x8a   : > { %v871_v9 = vpop.eup %870  ;;  %v547_v10 = vmul.f32 %v869_v4, %v1268_v38  ;;  %vm603_vm15 = vcmp.eq.f32.partialorder %v1300_v60, 0.0  ;;  %v604_v31 = vand.u32 2147483648, %v1300_v60  ;;  %v424_v35 = vrot.slane %v1306_v62, 1 }
  0x8b   : > { %v873_v12 = vpop.eup %872  ;;  %v554_v2 = vmul.f32 %v871_v9, %v1270_v42  ;;  %v413_v58 = vadd.f32 %v412_v61, %v1294_v30  ;;  %v502_v61 = vmul.f32 %v1246_v57, %v1238_v50 }
  0x8c   : > { %v875_v14 = vpop.eup %874  ;;  %v549_v15 = vsel %vm548_vm0, %v1268_v38, %v547_v10  ;;  %v561_v16 = vmul.f32 %v873_v12, %v1272_v43  ;;  %v425_v4 = vadd.f32 %v424_v35, %v1306_v62  ;;  %v501_v10 = vmul.f32 %v1244_v53, %v1236_v46 }
  0x8d   : > { %v877_v17 = vpop.eup %876  ;;  %v556_v18 = vsel %vm555_vm2, %v1270_v42, %v554_v2  ;;  %v568_v19 = vmul.f32 %v875_v14, %v1281_v47  ;;  %v552_v6 = vsel %vm550_vm1, %v551_v34, %v549_v15  ;;  %v497_v9 = vmul.f32 0.125, %v413_v58 }
  0x8e   : > { %v879_v20 = vpop.eup %878  ;;  %v563_v5 = vsel %vm562_vm4, %v1272_v43, %v561_v16  ;;  %v579_v21 = vmul.f32 %v877_v17, %v1285_v36  ;;  %v559_v27 = vsel %vm557_vm3, %v558_v1, %v556_v18  ;;  %v499_v12 = vmul.f32 0.125, %v425_v4 }
  0x8f   : > { %v881_v23 = vpop.eup %880  ;;  %v570_v24 = vsel %vm569_vm6, %v1281_v47, %v568_v19  ;;  %v586_v25 = vmul.f32 %v879_v20, %v1288_v55  ;;  %v566_v32 = vsel %vm564_vm5, %v565_v8, %v563_v5  ;;  %v430_v47 = vrot.slane %v1310_v0, 1 }
  0x90   : > { %v883_v26 = vpop.eup %882  ;;  %v581_v28 = vsel %vm580_vm8, %v1285_v36, %v579_v21  ;;  %v593_v29 = vmul.f32 %v881_v23, %v1291_v54  ;;  %v573_v41 = vsel %vm571_vm7, %v572_v11, %v570_v24  ;;  %v1042_v11 = vmov 1966171168  }
  0x91   : > { %v584_v33 = vsel %vm582_vm9, %v583_v13, %v581_v28  ;;  %v588_v39 = vsel %vm587_vm10, %v1288_v55, %v586_v25  ;;  %v600_v40 = vmul.f32 %v883_v26, %v1300_v60  ;;  %v503_v62 = vmul.f32 %v1248_v59, %v1240_v51 }
  0x92   : > { %v591_v38 = vsel %vm589_vm11, %v590_v3, %v588_v39  ;;  %v595_v42 = vsel %vm594_vm12, %v1291_v54, %v593_v29  ;;  %v606_v43 = vmul.f32 %v584_v33, %v552_v6  ;;  %v419_v54 = vadd.f32 %v418_v7, %v1298_v37 }
  0x93   : > { %v598_v44 = vsel %vm596_vm13, %v597_v22, %v595_v42  ;;  %v602_v45 = vsel %vm601_vm14, %v1300_v60, %v600_v40  ;;  %v607_v48 = vmul.f32 %v591_v38, %v559_v27  ;;  %v431_v60 = vadd.f32 %v430_v47, %v1310_v0 }
  0x94   : > { %v605_v49 = vsel %vm603_vm15, %v604_v31, %v602_v45  ;;  %v608_v36 = vmul.f32 %v598_v44, %v566_v32  ;;  %v610_v55 = vadd.f32 1e-06, %v606_v43  ;;  %v498_v30 = vmul.f32 0.125, %v419_v54 }
  0x95   : > { %v609_v56 = vmul.f32 %v605_v49, %v573_v41  ;;  %v611_v34 = vadd.f32 1e-06, %v607_v48  ;;  %v629_v37 = vunpack.c.l.s4 %v1042_v11  ;;  %v631_v7 = vlaneseq }
  0x96   : > { %v612_v1 = vadd.f32 1e-06, %v608_v36  ;;  %884 = vrcp.f32 %v610_v55  ;;  %v500_v2 = vmul.f32 0.125, %v431_v60  ;;  %v504_v0 = vmul.f32 %v1250_v63, %v1242_v52 }
  0x97   : > { %v613_v8 = vadd.f32 1e-06, %v609_v56  ;;  %886 = vrcp.f32 %v611_v34  ;;  %v505_v13 = vsub.f32 %v497_v9, %v501_v10  ;;  %v506_v14 = vsub.f32 %v498_v30, %v502_v61 }
  0x98   : > { %888 = vrcp.f32 %v612_v1  ;;  %v630_v46 = vunpack.c.0.s8 %v629_v37  ;;  %v632_v53 = vshrl.u32 %v631_v7, 7  ;;  %v507_v15 = vsub.f32 %v499_v12, %v503_v62 }
  0x99   : > { %890 = vrcp.f32 %v613_v8  ;;  %v508_v50 = vsub.f32 %v500_v2, %v504_v0  ;;  %vm653_vm0 = vcmp.lt.s32.totalorder %v631_v7, 512 }
  0x9a   : > { %v633_v19 = vsub.s32 %v630_v46, %v632_v53 }
  0xa0   : > { %v885_v16 = vpop.eup %884 }
  0xa1   : > { %v887_v57 = vpop.eup %886  ;;  %v615_v3 = vmul.f32 %v885_v16, %v505_v13 }
  0xa2   : > { %v889_v17 = vpop.eup %888  ;;  %v617_v18 = vmul.f32 %v887_v57, %v506_v14 }
  0xa3   : > { %v891_v20 = vpop.eup %890  ;;  %v619_v51 = vmul.f32 %v889_v17, %v507_v15 }
  0xa4   : > { %v621_v59 = vmul.f32 %v891_v20, %v508_v50  ;;  %v626_v5 = vcombine.low %v615_v3, %v617_v18 }
  0xa6   : > { %v627_v52 = vcombine.low %v619_v51, %v621_v59  ;;  %v634_v63 = vrot.slane %v626_v5, %v633_v19 }
  0xa8   : > { %v641_v21 = vrot.slane %v627_v52, %v633_v19 }
  0xaa   : > { %v642_v22 = vcombine.low %v634_v63, %v641_v21 }
  0xac   : > { %v649_v23 = vrot.slane %v642_v22, %v633_v19 }
  0xae   : > { %655 = vst.msk [vmem:[%s217_s19] sm:$0xf] %vm653_vm0, %v649_v23 }
  0xaf   : > { %965 = shalt.err (!%p962_p2)
}
  0xb0   : > { %s966_s8 = scalar_lea.hbm %s1407_s28, 64  ;;  %s970_s4 = scalar_lea.hbm %s1458_s2, 128 }
  0xb1   : > { %p967_p9 = scmp.ne.s32.totalorder %s1407_s28, %s966_s8  ;;  %p971_p6 = scmp.lt.u32.totalorder %s1407_s28, %s1458_s2 }
  0xb2   : > { %p972_p13 = scmp.lt.u32.totalorder %s970_s4, %s966_s8  ;;  %p974_p8 = scmp.lt.u32.totalorder %s966_s8, %s1407_s28 }
  0xb3   : > { %p968_p11 = pnand %p967_p9, %p1471_p0 }
  0xb4   : > { %p973_p5 = por %p972_p13, %p971_p6 }
  0xb5   : > { %p969_p3 = pneg %p968_p11 }
  0xb6   : > { %p975_p7 = por %p974_p8, %p973_p5 }
  0xb8   : > { %p976_p4 = pnand %p975_p7, %p969_p3 }
  0xba   : > { %979 = shalt.err (!%p976_p4)
}
  0xbb   : > { %804 = dma.vmem_to_hbm [thread:$0]  (%p1471_p0), %s1409_s30, 64, %s1407_s28, %s657_s29  }
  0xbc PF: > { %s683_s16 = sand.u32 1, %s1018_s9   ;;  %p1472_p10 = scmp.ne.s32.totalorder %s1464_s24, 0 }
  0xbd   : > { %p1473_p12 = scmp.ge.s32.totalorder %s1038_s14, 2  ;;  %s684_s21 = scalar_lea.sflag [#allocation9], %s683_s16 }
  0xbf   : > { %p814_p1 = pnand %p1473_p12, %p1472_p10 }
  0xc1   : > { %1013 = dma.done.wait (!%p814_p1), %s684_s21, 64  }
  0xc2   : > { %1015 = vsyncadd (!%p814_p1), %s684_s21, 4294967232  ;;  %s21_s14 = sadd.s32 1, %s1038_s14   ;;  %s1474_s9 = smov %s1022_s10 }
  0xc3   : > { %p18_p2 = scmp.ge.s32.totalorder %s21_s14, 4   ;;  %s1475_s10 = smov %s1026_s11 }
  0xc4   : > { %s1476_s11 = smov %s1115_s23  ;;  %s1477_s12 = smov %s1034_s13 }
  0xc5   : > { %s1478_s13 = smov %s1480_s17  ;;  %20 = sbr.rel (!%p18_p2) target bundleno = 8 (0x8), region = 94 }
  0xcc   :  { %689 = vsyncpa [#allocation8], 1 }
  0xcd   :  { %691 = vsyncpa [#allocation8 + $0x1], 1 }
  0xce   :  { %692 = vsyncpa [#allocation11], 1 }
  0xcf   :  { %694 = vsyncpa [#allocation11 + $0x1], 1 }
  0xd0   :  { %695 = vsyncpa [#allocation9], 1 }
  0xd1   :  { %697 = vsyncpa [#allocation9 + $0x1], 1 }

</bundles_post_ra>
